<compile_context>
chip_gen: v5e
topology: v5e:2x2
jax: 0.10.0
libtpu: 0.0.40
codegen_flags: <defaults>
</compile_context>

<pallas_src>
import jax
import jax.numpy as jnp
from jax.experimental import pallas as pl
from jax.experimental.pallas import tpu as pltpu

LANE = 128


# ---------------------------------------------------------------------------
# Pallas kernel: full GCN forward (both branches, all 3 layers) fused.
# bf16 MXU inputs, f32 accumulation, f32 bias-add/ReLU, lane-dense (128) slabs.
# ---------------------------------------------------------------------------
def gcn_fused_kernel(a_ref, x_ref, w1_ref, b1_ref, w2_ref, b2_ref,
                     w3_ref, b3_ref, o_ref):
    a = a_ref[...]          # bf16 A_hat, resident in VMEM once for all 6 aggregations
    h = x_ref[...]          # bf16 features

    # ---- layer 1: [N, F_in] @ [F_in, 128] -> aggregate -> relu ------------
    h = jnp.dot(h, w1_ref[...], preferred_element_type=jnp.float32)
    h = jnp.dot(a, h.astype(jnp.bfloat16), preferred_element_type=jnp.float32)
    h = jnp.maximum(h + b1_ref[...], 0.0).astype(jnp.bfloat16)

    # ---- layer 2: block-diagonal weights keep the c/s branches separate ---
    h = jnp.dot(h, w2_ref[...], preferred_element_type=jnp.float32)
    h = jnp.dot(a, h.astype(jnp.bfloat16), preferred_element_type=jnp.float32)
    h = jnp.maximum(h + b2_ref[...], 0.0).astype(jnp.bfloat16)

    # nn.Dropout between layers 2 and 3: identity in eval mode.

    # ---- layer 3: [N, 128] @ [128, 128] -> aggregate -> relu --------------
    # (reference model passes `activation` to the last GraphConv too, so the
    #  final relu matches the PyTorch forward)
    h = jnp.dot(h, w3_ref[...], preferred_element_type=jnp.float32)
    h = jnp.dot(a, h.astype(jnp.bfloat16), preferred_element_type=jnp.float32)
    o_ref[...] = jnp.maximum(h + b3_ref[...], 0.0)


# ---------------------------------------------------------------------------
# Wrapper: merge + lane-pad branch weights, cast MXU operands to bf16, launch
# one pallas_call, and slice the real branch outputs back out.
# ---------------------------------------------------------------------------
def _round_up(x, m):
    return ((x + m - 1) // m) * m


def gcn_forward(a_hat, features, params):
    n, f_in = features.shape
    n_hidden = params["c1_w"].shape[1]
    n_classes = params["c3_w"].shape[1]
    h2 = 2 * n_hidden
    c2 = 2 * n_classes
    lane_h = _round_up(max(h2, LANE), LANE)   # padded hidden lane width (>=128)
    lane_c = _round_up(max(c2, LANE), LANE)   # padded output lane width (>=128)

    def pad2(m, rows, cols):
        return jnp.pad(m, ((0, rows - m.shape[0]), (0, cols - m.shape[1])))

    # Merge the two branches (exact: concat / block-diag), then zero-pad the
    # lane dims to multiples of 128 so every store is an unmasked full vst and
    # every MXU tile is dense.  Padded lanes stay exactly zero through relu.
    w1 = pad2(jnp.concatenate([params["c1_w"], params["s1_w"]], axis=1),
              f_in, lane_h)                                              # [F_in, 128]
    w2 = pad2(jax.scipy.linalg.block_diag(params["c2_w"], params["s2_w"]),
              lane_h, lane_h)                                            # [128, 128]
    w3 = pad2(jax.scipy.linalg.block_diag(params["c3_w"], params["s3_w"]),
              lane_h, lane_c)                                            # [128, 128]
    b1 = pad2(jnp.concatenate([params["c1_b"], params["s1_b"]])[None, :], 1, lane_h)
    b2 = pad2(jnp.concatenate([params["c2_b"], params["s2_b"]])[None, :], 1, lane_h)
    b3 = pad2(jnp.concatenate([params["c3_b"], params["s3_b"]])[None, :], 1, lane_c)

    # bf16 MXU inputs (f32 accumulation happens inside the kernel).
    a_bf = a_hat.astype(jnp.bfloat16)
    x_bf = features.astype(jnp.bfloat16)
    w1 = w1.astype(jnp.bfloat16)
    w2 = w2.astype(jnp.bfloat16)
    w3 = w3.astype(jnp.bfloat16)

    # Advisory cost hint for the XLA scheduler (padded widths).
    flops = (2 * n * (f_in * lane_h + n * lane_h)       # layer 1: XW + A@XW
             + 2 * n * (lane_h * lane_h + n * lane_h)   # layer 2
             + 2 * n * (lane_h * lane_c + n * lane_c))  # layer 3
    bytes_accessed = (2 * (a_bf.size + x_bf.size + w1.size + w2.size + w3.size)
                      + 4 * (b1.size + b2.size + b3.size + n * lane_c))

    vmem_spec = pl.BlockSpec(memory_space=pltpu.MemorySpace.VMEM)
    out = pl.pallas_call(
        gcn_fused_kernel,
        out_shape=jax.ShapeDtypeStruct((n, lane_c), jnp.float32),
        in_specs=[vmem_spec] * 8,
        out_specs=vmem_spec,
        cost_estimate=pl.CostEstimate(
            flops=flops, transcendentals=0, bytes_accessed=bytes_accessed),
    )(a_bf, x_bf, w1, b1, w2, b2, w3, b3)

    # Split the lane-concatenated (and padded) result back into the branches.
    return out[:, :n_classes], out[:, n_classes:c2]


# ---------------------------------------------------------------------------
# Deterministic parameter / graph construction.
# ---------------------------------------------------------------------------
def glorot(key, shape):
    fan_in, fan_out = shape
    limit = jnp.sqrt(6.0 / (fan_in + fan_out))
    return jax.random.uniform(key, shape, jnp.float32, -limit, limit)


def make_params(key, in_feats, n_hidden, n_classes):
    dims = [(in_feats, n_hidden), (n_hidden, n_hidden), (n_hidden, n_classes)]
    params = {}
    keys = jax.random.split(key, 6)
    k_idx = 0
    for prefix in ("c", "s"):
        for layer, (fi, fo) in enumerate(dims, start=1):
            params[f"{prefix}{layer}_w"] = glorot(keys[k_idx], (fi, fo))
            params[f"{prefix}{layer}_b"] = jnp.zeros((fo,), jnp.float32)
            k_idx += 1
    return params


def make_normalized_adjacency(key, n_nodes):
    # random undirected graph + self loops, then D^{-1/2} (A+I) D^{-1/2}
    a = (jax.random.uniform(key, (n_nodes, n_nodes)) < 0.3).astype(jnp.float32)
    a = jnp.maximum(a, a.T)                      # symmetrize
    a = jnp.maximum(a, jnp.eye(n_nodes))         # add self loops
    deg = jnp.sum(a, axis=1)
    d_inv_sqrt = 1.0 / jnp.sqrt(deg)
    return a * d_inv_sqrt[:, None] * d_inv_sqrt[None, :]


# ---------------------------------------------------------------------------
# Main
# ---------------------------------------------------------------------------
if __name__ == "__main__":
    key = jax.random.PRNGKey(0)
    k_graph, k_feat, k_params = jax.random.split(key, 3)

    N_NODES = 8
    IN_FEATS = 16
    N_HIDDEN = 32
    N_CLASSES = 8

    a_hat = make_normalized_adjacency(k_graph, N_NODES)
    features = jax.random.normal(k_feat, (N_NODES, IN_FEATS), jnp.float32)
    params = make_params(k_params, IN_FEATS, N_HIDDEN, N_CLASSES)

    x1, x2 = jax.jit(gcn_forward)(a_hat, features, params)
    jax.block_until_ready((x1, x2))

    assert x1.shape == (N_NODES, N_CLASSES)
    assert x2.shape == (N_NODES, N_CLASSES)

    # Pure-JAX f32 reference (per-branch, un-merged weights) for a sanity check.
    # Tolerance is sized for the bf16-operand / f32-accumulate MXU path.
    def ref_branch(prefix):
        h = features
        for layer in range(1, 4):
            h = jnp.maximum(
                a_hat @ (h @ params[f"{prefix}{layer}_w"])
                + params[f"{prefix}{layer}_b"], 0.0)
        return h

    r1, r2 = ref_branch("c"), ref_branch("s")
    assert jnp.allclose(x1, r1, rtol=3e-2, atol=3e-2)
    assert jnp.allclose(x2, r2, rtol=3e-2, atol=3e-2)

    print("KERNEL_OK")
</pallas_src>

<mosaic_0001>
module attributes {stable_mosaic.version = 11 : i64} {
  func.func @gcn_fused_kernel(%arg0: memref<8x8xbf16, #tpu.memory_space<vmem>>, %arg1: memref<8x16xbf16, #tpu.memory_space<vmem>>, %arg2: memref<16x128xbf16, #tpu.memory_space<vmem>>, %arg3: memref<1x128xf32, #tpu.memory_space<vmem>>, %arg4: memref<128x128xbf16, #tpu.memory_space<vmem>>, %arg5: memref<1x128xf32, #tpu.memory_space<vmem>>, %arg6: memref<128x128xbf16, #tpu.memory_space<vmem>>, %arg7: memref<1x128xf32, #tpu.memory_space<vmem>>, %arg8: memref<8x128xf32, #tpu.memory_space<vmem>>) attributes {dimension_semantics = [], scalar_prefetch = 0 : i64, scratch_operands = 0 : i64, tpu.core_type = #tpu.core_type<tc>} {
    %c0 = arith.constant 0 : index
    %c0_0 = arith.constant 0 : index
    %0 = vector.load %arg0[%c0, %c0_0] : memref<8x8xbf16, #tpu.memory_space<vmem>>, vector<8x8xbf16>
    %c0_1 = arith.constant 0 : index
    %c0_2 = arith.constant 0 : index
    %1 = vector.load %arg1[%c0_1, %c0_2] : memref<8x16xbf16, #tpu.memory_space<vmem>>, vector<8x16xbf16>
    %c0_3 = arith.constant 0 : index
    %c0_4 = arith.constant 0 : index
    %2 = vector.load %arg2[%c0_3, %c0_4] : memref<16x128xbf16, #tpu.memory_space<vmem>>, vector<16x128xbf16>
    %cst = arith.constant dense<0.000000e+00> : vector<8x128xf32>
    %3 = tpu.matmul %1, %2, %cst {dimension_numbers = #tpu.dot_dimension_numbers<[1], [0], [0], [1], [0, 0, 1, 1], [], []>} : vector<8x16xbf16>, vector<16x128xbf16>, vector<8x128xf32> -> vector<8x128xf32>
    %4 = arith.truncf %3 : vector<8x128xf32> to vector<8x128xbf16>
    %cst_5 = arith.constant dense<0.000000e+00> : vector<8x128xf32>
    %5 = tpu.matmul %0, %4, %cst_5 {dimension_numbers = #tpu.dot_dimension_numbers<[1], [0], [0], [1], [0, 0, 1, 1], [], []>} : vector<8x8xbf16>, vector<8x128xbf16>, vector<8x128xf32> -> vector<8x128xf32>
    %c0_6 = arith.constant 0 : index
    %c0_7 = arith.constant 0 : index
    %6 = vector.load %arg3[%c0_6, %c0_7] : memref<1x128xf32, #tpu.memory_space<vmem>>, vector<1x128xf32>
    %7 = vector.broadcast %6 : vector<1x128xf32> to vector<8x128xf32>
    %8 = arith.addf %5, %7 : vector<8x128xf32>
    %cst_8 = arith.constant 0.000000e+00 : f32
    %9 = vector.broadcast %cst_8 : f32 to vector<8x128xf32>
    %10 = arith.maximumf %8, %9 : vector<8x128xf32>
    %11 = arith.truncf %10 : vector<8x128xf32> to vector<8x128xbf16>
    %c0_9 = arith.constant 0 : index
    %c0_10 = arith.constant 0 : index
    %12 = vector.load %arg4[%c0_9, %c0_10] : memref<128x128xbf16, #tpu.memory_space<vmem>>, vector<128x128xbf16>
    %cst_11 = arith.constant dense<0.000000e+00> : vector<8x128xf32>
    %13 = tpu.matmul %11, %12, %cst_11 {dimension_numbers = #tpu.dot_dimension_numbers<[1], [0], [0], [1], [0, 0, 1, 1], [], []>} : vector<8x128xbf16>, vector<128x128xbf16>, vector<8x128xf32> -> vector<8x128xf32>
    %14 = arith.truncf %13 : vector<8x128xf32> to vector<8x128xbf16>
    %cst_12 = arith.constant dense<0.000000e+00> : vector<8x128xf32>
    %15 = tpu.matmul %0, %14, %cst_12 {dimension_numbers = #tpu.dot_dimension_numbers<[1], [0], [0], [1], [0, 0, 1, 1], [], []>} : vector<8x8xbf16>, vector<8x128xbf16>, vector<8x128xf32> -> vector<8x128xf32>
    %c0_13 = arith.constant 0 : index
    %c0_14 = arith.constant 0 : index
    %16 = vector.load %arg5[%c0_13, %c0_14] : memref<1x128xf32, #tpu.memory_space<vmem>>, vector<1x128xf32>
    %17 = vector.broadcast %16 : vector<1x128xf32> to vector<8x128xf32>
    %18 = arith.addf %15, %17 : vector<8x128xf32>
    %cst_15 = arith.constant 0.000000e+00 : f32
    %19 = vector.broadcast %cst_15 : f32 to vector<8x128xf32>
    %20 = arith.maximumf %18, %19 : vector<8x128xf32>
    %21 = arith.truncf %20 : vector<8x128xf32> to vector<8x128xbf16>
    %c0_16 = arith.constant 0 : index
    %c0_17 = arith.constant 0 : index
    %22 = vector.load %arg6[%c0_16, %c0_17] : memref<128x128xbf16, #tpu.memory_space<vmem>>, vector<128x128xbf16>
    %cst_18 = arith.constant dense<0.000000e+00> : vector<8x128xf32>
    %23 = tpu.matmul %21, %22, %cst_18 {dimension_numbers = #tpu.dot_dimension_numbers<[1], [0], [0], [1], [0, 0, 1, 1], [], []>} : vector<8x128xbf16>, vector<128x128xbf16>, vector<8x128xf32> -> vector<8x128xf32>
    %24 = arith.truncf %23 : vector<8x128xf32> to vector<8x128xbf16>
    %cst_19 = arith.constant dense<0.000000e+00> : vector<8x128xf32>
    %25 = tpu.matmul %0, %24, %cst_19 {dimension_numbers = #tpu.dot_dimension_numbers<[1], [0], [0], [1], [0, 0, 1, 1], [], []>} : vector<8x8xbf16>, vector<8x128xbf16>, vector<8x128xf32> -> vector<8x128xf32>
    %c0_20 = arith.constant 0 : index
    %c0_21 = arith.constant 0 : index
    %26 = vector.load %arg7[%c0_20, %c0_21] : memref<1x128xf32, #tpu.memory_space<vmem>>, vector<1x128xf32>
    %27 = vector.broadcast %26 : vector<1x128xf32> to vector<8x128xf32>
    %28 = arith.addf %25, %27 : vector<8x128xf32>
    %cst_22 = arith.constant 0.000000e+00 : f32
    %29 = vector.broadcast %cst_22 : f32 to vector<8x128xf32>
    %30 = arith.maximumf %28, %29 : vector<8x128xf32>
    %c0_23 = arith.constant 0 : index
    %c0_24 = arith.constant 0 : index
    %31 = vector.load %arg8[%c0_23, %c0_24] : memref<8x128xf32, #tpu.memory_space<vmem>>, vector<8x128xf32>
    tpu.vector_store %arg8[%c0_23, %c0_24], %30 {strides = array<i32>} : memref<8x128xf32, #tpu.memory_space<vmem>>, vector<8x128xf32>,
    return
  }
}

</mosaic_0001>

<bundles_post_ra>
// kernel: gcn_forward.1
= control target key start
LH: loop header
LB: loop body
LE: loop exit
PB: predicated region body
PF: predicated region fallthrough
CT: control target
= control target key end

     0   :  { %vm40_vm0 = vcmask 130048   ;;  %vm66_vm1 = vcmask 1043456   ;;  %vm62_vm2 = vcmask 64512   ;;  %s501_s2 = inlined_call_operand.vmem [shape: bf16[16,128], index: 2, kind: input, shape index: {}]   ;;  %s502_s1 = inlined_call_operand.vmem [shape: bf16[8,16], index: 1, kind: input, shape index: {}]   ;;  %s503_s3 = inlined_call_operand.vmem [shape: f32[1,128], index: 3, kind: input, shape index: {}]   ;;  %s504_s4 = inlined_call_operand.vmem [shape: bf16[128,128], index: 4, kind: input, shape index: {}]   ;;  %s505_s0 = inlined_call_operand.vmem [shape: bf16[8,8], index: 0, kind: input, shape index: {}]   ;;  %s506_s5 = inlined_call_operand.vmem [shape: f32[1,128], index: 5, kind: input, shape index: {}]   ;;  %s507_s6 = inlined_call_operand.vmem [shape: bf16[128,128], index: 6, kind: input, shape index: {}]   ;;  %s508_s7 = inlined_call_operand.vmem [shape: f32[1,128], index: 7, kind: input, shape index: {}]   ;;  %s509_s8 = inlined_call_operand.vmem [shape: f32[8,128], index: 8, kind: output, shape index: {}]  }
   0x1   :  { %v361_v0 = vld [vmem:[%s501_s2] sm:$0xff]  ;;  %v369_v2 = vld [vmem:[%s504_s4 + $0x38] sm:$0xff]  ;;  %v368_v3 = vld [vmem:[%s504_s4 + $0x30] sm:$0xff] }
   0x2   :  { %51 = vmatpush.bf16.msra.mxu3 %v361_v0  ;;  %v31_v1 = vld [vmem:[%s502_s1] sm:$0xf]  ;;  %149 = vmatpush.bf16.msra.mxu2 %v369_v2  ;;  %v367_v4 = vld [vmem:[%s504_s4 + $0x28] sm:$0xff]  ;;  %v365_v6 = vld [vmem:[%s504_s4 + $0x18] sm:$0xff] }
   0x3   :  { %v366_v5 = vld [vmem:[%s504_s4 + $0x20] sm:$0xff]  ;;  %v364_v7 = vld [vmem:[%s504_s4 + $0x10] sm:$0xff]  ;;  %v363_v13 = vld [vmem:[%s504_s4 + $0x8] sm:$0xff] }
   0x4   :  { %v30_v11 = vld [vmem:[%s505_s0] sm:$0xf]  ;;  %v377_v21 = vld [vmem:[%s507_s6 + $0x38] sm:$0xff]  ;;  %v376_v22 = vld [vmem:[%s507_s6 + $0x30] sm:$0xff] }
   0x5   :  { %293 = vmatmul.msk.bf16.vlgmr.msra.gmra.mxu3 %vm40_vm0, %v31_v1  ;;  %v362_v14 = vld [vmem:[%s504_s4] sm:$0xff]  ;;  %249 = vmatpush.bf16.msra.mxu0 %v377_v21  ;;  %v375_v23 = vld [vmem:[%s507_s6 + $0x28] sm:$0xff]  ;;  %v373_v25 = vld [vmem:[%s507_s6 + $0x18] sm:$0xff] }
   0x6   :  { %150 = vmatpush.bf16.msra.mxu2 %v368_v3  ;;  %v378_v15 = vld [vmem:[%s503_s3] ss:$0 sm:$0xff]  ;;  %v372_v26 = vld [vmem:[%s507_s6 + $0x10] sm:$0xff]  ;;  %v371_v31 = vld [vmem:[%s507_s6 + $0x8] sm:$0xff] }
   0x7   :  { %v374_v24 = vld [vmem:[%s507_s6 + $0x20] sm:$0xff] }
   0x8   :  { %v370_v32 = vld [vmem:[%s507_s6] sm:$0xff] }
   0x9   :  { %250 = vmatpush.bf16.msra.mxu0 %v376_v22  ;;  %v379_v33 = vld [vmem:[%s506_s5] ss:$0 sm:$0xff] }
   0xa   :  { %151 = vmatpush.bf16.msra.mxu2 %v367_v4  ;;  %v380_v43 = vld [vmem:[%s508_s7] ss:$0 sm:$0xff] }
   0xd   :  { %251 = vmatpush.bf16.msra.mxu0 %v375_v23 }
   0xe   :  { %152 = vmatpush.bf16.msra.mxu2 %v366_v5 }
  0x11   :  { %252 = vmatpush.bf16.msra.mxu0 %v374_v24 }
  0x12   :  { %153 = vmatpush.bf16.msra.mxu2 %v365_v6 }
  0x15   :  { %253 = vmatpush.bf16.msra.mxu0 %v373_v25 }
  0x16   :  { %154 = vmatpush.bf16.msra.mxu2 %v364_v7 }
  0x19   :  { %254 = vmatpush.bf16.msra.mxu0 %v372_v26 }
  0x1a   :  { %155 = vmatpush.bf16.msra.mxu2 %v363_v13 }
  0x1d   :  { %255 = vmatpush.bf16.msra.mxu0 %v371_v31 }
  0x1e   :  { %156 = vmatpush.bf16.msra.mxu2 %v362_v14 }
  0x21   :  { %256 = vmatpush.bf16.msra.mxu0 %v370_v32 }
  0x88   :  { %v53_v8 = vpop.f32.mrf.mxu3 }
  0x89   :  { %v57_v9 = vpack.c.bf16 %v53_v8, %v53_v8 }
  0x8b   :  { %v68_v10 = vsel %vm66_vm1, %v57_v9, 0 }
  0x8c   :  { %77 = vmatpush.bf16.msra.mxu1 %v68_v10 }
  0x8f   :  { %294 = vmatmul.msk.bf16.vlgmr.msra.gmra.mxu1 %vm62_vm2, %v30_v11 }
  0x90   :  { %v55_v12 = vpop.f32.mrf.mxu3 }
 0x10c   :  { %v79_v16 = vpop.f32.mrf.mxu1 }
 0x10d   :  { %v80_v17 = vadd.f32 %v378_v15, %v79_v16 }
 0x10f   :  { %v83_v18 = vmax.f32 %v80_v17, 0.0 }
 0x111   :  { %v84_v19 = vpack.c.bf16 %v83_v18, %v83_v18 }
 0x113   :  { %157 = vmatmul.bf16.vlgmr.msra.gmra.mxu2 %v84_v19 }
 0x114   :  { %v81_v20 = vpop.f32.mrf.mxu1 }
 0x196   :  { %v158_v27 = vpop.f32.mrf.mxu2 }
 0x197   :  { %v162_v28 = vpack.c.bf16 %v158_v27, %v158_v27 }
 0x199   :  { %v168_v29 = vsel %vm66_vm1, %v162_v28, 0 }
 0x19a   :  { %177 = vmatpush.bf16.msrb.mxu3 %v168_v29 }
 0x19d   :  { %327 = vmatmul.msk.bf16.vlgmr.msrb.gmra.mxu3 %vm62_vm2, %v30_v11 }
 0x19e   :  { %v160_v30 = vpop.f32.mrf.mxu2 }
 0x220   :  { %v179_v34 = vpop.f32.mrf.mxu3 }
 0x221   :  { %v180_v35 = vadd.f32 %v379_v33, %v179_v34 }
 0x223   :  { %v183_v36 = vmax.f32 %v180_v35, 0.0 }
 0x225   :  { %v184_v37 = vpack.c.bf16 %v183_v36, %v183_v36 }
 0x227   :  { %257 = vmatmul.bf16.vlgmr.msra.gmra.mxu0 %v184_v37 }
 0x228   :  { %v181_v38 = vpop.f32.mrf.mxu3 }
 0x2a4   :  { %v258_v39 = vpop.f32.mrf.mxu0 }
 0x2a5   :  { %v262_v40 = vpack.c.bf16 %v258_v39, %v258_v39 }
 0x2a7   :  { %v268_v41 = vsel %vm66_vm1, %v262_v40, 0 }
 0x2a8   :  { %277 = vmatpush.bf16.msrb.mxu1 %v268_v41 }
 0x2ab   :  { %360 = vmatmul.msk.bf16.vlgmr.msrb.gmra.mxu1 %vm62_vm2, %v30_v11 }
 0x2ac   :  { %v260_v42 = vpop.f32.mrf.mxu0 }
 0x328   :  { %v279_v44 = vpop.f32.mrf.mxu1 }
 0x329   :  { %v280_v45 = vadd.f32 %v380_v43, %v279_v44 }
 0x32b   :  { %v283_v46 = vmax.f32 %v280_v45, 0.0 }
 0x32d   :  { %284 = vst [vmem:[%s509_s8] sm:$0xff] %v283_v46 }
 0x330   :  { %v281_v47 = vpop.f32.mrf.mxu1 }

</bundles_post_ra>
